<compile_context>
chip_gen: v6e
topology: v6e:2x2x1
jax: 0.10.0
libtpu: 0.0.40
codegen_flags: <defaults>
</compile_context>

<pallas_src>
import functools

import jax
import jax.numpy as jnp
from jax import lax
from jax.experimental import pallas as pl
from jax.experimental.pallas import tpu as pltpu


def _round_up(x: int, m: int) -> int:
    return ((x + m - 1) // m) * m


def _vmem_limit_bytes() -> int:
    """Generation-aware scoped-VMEM limit (v7x: 64 MiB physical, v5e/v6e: 128 MiB)."""
    cap = 64 * 1024 * 1024  # conservative default: assume a v7x-class part
    try:
        cap = int(pltpu.get_tpu_info().vmem_capacity_bytes)
    except Exception:
        pass
    if cap <= 64 * 1024 * 1024:
        return 48 * 1024 * 1024   # leave headroom on v7x
    return 96 * 1024 * 1024       # v5e / v6e: raise well past the 16/32 MiB defaults


def _tile_plan(n: int, m: int, c: int, in_itemsize: int, out_itemsize: int):
    """Pick (tm, tn) output-tile sizes.

    Big lane-dense tiles (up to 512 x 1024) amortize the ~0.35 us per-grid-step
    overhead and cut redundant re-reads of the streamed operand.  Tiles never
    exceed the true array dims (block == full dim is always legal); they are
    only shrunk if double-buffered operands would blow a conservative ~36 MiB
    live-buffer budget (safe on every TPU generation).
    """
    tm = n if n <= 512 else 512        # multiple of 8, or equal to full dim
    tn = m if m <= 1024 else 1024      # multiple of 128, or equal to full dim

    def live_bytes(tm_, tn_):
        # 2x double-buffered A, B input tiles + 2x output tile.
        return 2 * (tm_ * c * in_itemsize + tn_ * c * in_itemsize
                    + tm_ * tn_ * out_itemsize)

    budget = 36 * 1024 * 1024
    while live_bytes(tm, tn) > budget and tn > 128:
        tn = max(128, _round_up(tn // 2, 128))
    while live_bytes(tm, tn) > budget and tm > 8:
        tm = max(8, _round_up(tm // 2, 8))

    # v7x megacore: if the whole problem fits in one block but is big enough
    # to be multi-microsecond, split one parallel axis so both TCs get work.
    if pl.cdiv(n, tm) * pl.cdiv(m, tn) == 1 and n * m >= 256 * 256:
        if m >= n and tn > 128:
            tn = max(128, _round_up(tn // 2, 128))
        elif tm > 8:
            tm = max(8, _round_up(tm // 2, 8))
    return tm, tn


def _pairwise_l2_kernel(a_ref, b_ref, o_ref):
    """o[i, j] = || a[i, :] - b[j, :] ||_2 for one (tm, tn) output tile.

    Uses ||a-b||^2 = ||a||^2 + ||b||^2 - 2 a.b.  The N*M*C work is a single
    MXU contraction (contracting axis 1 of both operands -> no explicit
    transpose, f32 accumulation).  Row norms are computed in-kernel:
    ||a||^2 as a lane reduction (XLU slot, idle under the MXU/VPU work) and
    ||b||^2 as a tiny ones-row matmul so it lands directly in (1, tn) lane
    layout.  The epilogue (add / max / sqrt / cast) runs on VPU + EUP.
    """
    a = a_ref[...]                                        # (tm, c), input dtype
    b = b_ref[...]                                        # (tn, c), input dtype

    ab = lax.dot_general(                                 # MXU: (tm, tn) f32
        a, b,
        dimension_numbers=(((1,), (1,)), ((), ())),
        preferred_element_type=jnp.float32,
    )

    a32 = a.astype(jnp.float32)
    b32 = b.astype(jnp.float32)
    a2 = jnp.sum(a32 * a32, axis=-1, keepdims=True)       # (tm, 1)  XLU reduce
    ones_row = jnp.ones((1, b32.shape[1]), jnp.float32)
    b2 = lax.dot_general(                                  # (1, tn)  tiny MXU matmul
        ones_row, b32 * b32,
        dimension_numbers=(((1,), (1,)), ((), ())),
        preferred_element_type=jnp.float32,
    )

    sq = a2 + b2 - 2.0 * ab                               # broadcast -> (tm, tn)
    sq = jnp.maximum(sq, 0.0)                             # numerical safety
    o_ref[...] = jnp.sqrt(sq).astype(o_ref.dtype)


@functools.partial(jax.jit, static_argnames=("out_dtype",))
def _pairwise_l2(cs_field: jax.Array, ds_field: jax.Array,
                 *, out_dtype=jnp.float32) -> jax.Array:
    n, c = cs_field.shape
    m, c2 = ds_field.shape
    assert c == c2, "tracklet/detection feature dims must match"

    if n == 0 or m == 0:
        return jnp.zeros((n, m), out_dtype)

    in_itemsize = max(jnp.dtype(cs_field.dtype).itemsize,
                      jnp.dtype(ds_field.dtype).itemsize)
    out_itemsize = jnp.dtype(out_dtype).itemsize
    tm, tn = _tile_plan(n, m, c, in_itemsize, out_itemsize)
    gn, gm = pl.cdiv(n, tm), pl.cdiv(m, tn)

    # Grid order: the LARGER operand is indexed by the outer axis, so it is
    # DMA'd from HBM exactly once; the smaller operand is re-streamed on the
    # inner axis (re-read <outer-count> times).
    if m >= n:
        grid = (gm, gn)                                  # M-tiles outer, N inner
        cs_map = lambda jo, ji: (ji, 0)
        ds_map = lambda jo, ji: (jo, 0)
        out_map = lambda jo, ji: (ji, jo)
    else:
        grid = (gn, gm)                                  # N-tiles outer, M inner
        cs_map = lambda io, ii: (io, 0)
        ds_map = lambda io, ii: (ii, 0)
        out_map = lambda io, ii: (io, ii)

    return pl.pallas_call(
        _pairwise_l2_kernel,
        out_shape=jax.ShapeDtypeStruct((n, m), out_dtype),
        grid=grid,
        in_specs=[
            pl.BlockSpec((tm, c), cs_map),               # cs rows (C kept whole)
            pl.BlockSpec((tn, c), ds_map),               # ds rows (C kept whole)
        ],
        out_specs=pl.BlockSpec((tm, tn), out_map),
        compiler_params=pltpu.CompilerParams(
            dimension_semantics=("parallel", "parallel"),
            vmem_limit_bytes=_vmem_limit_bytes(),
        ),
    )(cs_field, ds_field)


class FieldCost:
    """JAX/Pallas port of unitrack's FieldCost (compute = pairwise L2 distance).

    Optional performance knobs (defaults preserve full-f32 behaviour):
      * mxu_dtype:  cast the selected fields (e.g. to jnp.bfloat16) before the
                    MXU contraction -- halves input DMA bytes and runs the MXU
                    at full rate, at an accuracy cost for near-identical
                    embeddings (Gram-trick cancellation).
      * out_dtype:  dtype of the returned cost matrix (e.g. jnp.bfloat16) --
                    halves the output HBM write, the binding slot for small C.
    """

    def __init__(self, field: str, select=None, *, mxu_dtype=None,
                 out_dtype=jnp.float32):
        self.field = field
        self.select = list(select) if select is not None else []
        self.required_fields = [field]
        self.mxu_dtype = mxu_dtype
        self.out_dtype = out_dtype

    def get_field(self, cs: dict, ds: dict):
        ts_field = cs[self.field]
        ds_field = ds[self.field]
        if len(self.select) > 0:
            # Strict bound (fixes the >= off-by-one in the reference assert).
            assert ts_field.shape[1] > max(self.select)
            assert ds_field.shape[1] > max(self.select)
            sel = self.select
            if sel == list(range(sel[0], sel[0] + len(sel))):
                # Contiguous selection -> cheap static slice (no XLA gather).
                lo, hi = sel[0], sel[0] + len(sel)
                ts_field = ts_field[:, lo:hi]
                ds_field = ds_field[:, lo:hi]
            else:
                idx = jnp.asarray(sel, dtype=jnp.int32)
                ts_field = jnp.take(ts_field, idx, axis=1)
                ds_field = jnp.take(ds_field, idx, axis=1)
        return ts_field, ds_field

    def compute(self, cs_field: jax.Array, ds_field: jax.Array) -> jax.Array:
        if self.mxu_dtype is not None:
            cs_field = cs_field.astype(self.mxu_dtype)
            ds_field = ds_field.astype(self.mxu_dtype)
        return _pairwise_l2(cs_field, ds_field, out_dtype=self.out_dtype)

    def __call__(self, cs: dict, ds: dict) -> jax.Array:
        ts_field, ds_field = self.get_field(cs, ds)
        return self.compute(ts_field, ds_field)


def _ref_l2(a: jax.Array, b: jax.Array) -> jax.Array:
    a = a.astype(jnp.float32)
    b = b.astype(jnp.float32)
    return jnp.sqrt(
        jnp.maximum(jnp.sum((a[:, None, :] - b[None, :, :]) ** 2, axis=-1), 0.0)
    )


if __name__ == "__main__":
    key = jax.random.PRNGKey(0)
    k_cs, k_ds, k_cs2, k_ds2, k_cs3, k_ds3 = jax.random.split(key, 6)

    # --- Case 1: toy shapes, exercise the `select` path -------------------
    N, M, C = 8, 6, 32  # tracklets, detections, feature channels
    cs = {"embedding": jax.random.normal(k_cs, (N, C), dtype=jnp.float32)}
    ds = {"embedding": jax.random.normal(k_ds, (M, C), dtype=jnp.float32)}

    cost_fn = FieldCost(field="embedding", select=list(range(16)))
    cost = jax.block_until_ready(cost_fn(cs, ds))

    ref = _ref_l2(cs["embedding"][:, :16], ds["embedding"][:, :16])
    assert cost.shape == (N, M)
    assert jnp.allclose(cost, ref, atol=1e-4, rtol=1e-4)

    # --- Case 2: non-aligned shapes (no padding, full-dim blocks) ---------
    N2, M2, C2 = 20, 300, 7
    cs2 = {"embedding": jax.random.normal(k_cs2, (N2, C2), dtype=jnp.float32)}
    ds2 = {"embedding": jax.random.normal(k_ds2, (M2, C2), dtype=jnp.float32)}

    cost_fn2 = FieldCost(field="embedding")
    cost2 = jax.block_until_ready(cost_fn2(cs2, ds2))

    ref2 = _ref_l2(cs2["embedding"], ds2["embedding"])
    assert cost2.shape == (N2, M2)
    assert jnp.allclose(cost2, ref2, atol=1e-3, rtol=1e-3)

    # --- Case 3: multi-tile grid with a partial trailing M tile -----------
    N3, M3, C3 = 24, 1200, 24
    cs3 = {"embedding": jax.random.normal(k_cs3, (N3, C3), dtype=jnp.float32)}
    ds3 = {"embedding": jax.random.normal(k_ds3, (M3, C3), dtype=jnp.float32)}

    cost_fn3 = FieldCost(field="embedding")
    cost3 = jax.block_until_ready(cost_fn3(cs3, ds3))

    ref3 = _ref_l2(cs3["embedding"], ds3["embedding"])
    assert cost3.shape == (N3, M3)
    assert jnp.allclose(cost3, ref3, atol=1e-3, rtol=1e-3)

    print("KERNEL_OK")
</pallas_src>

<mosaic_0001>
module attributes {stable_mosaic.version = 11 : i64} {
  func.func @_pairwise_l2_kernel(%arg0: i32, %arg1: i32, %arg2: memref<8x16xf32, #tpu.memory_space<vmem>>, %arg3: memref<6x16xf32, #tpu.memory_space<vmem>>, %arg4: memref<8x6xf32, #tpu.memory_space<vmem>>) attributes {dimension_semantics = [#tpu.dimension_semantics<parallel>, #tpu.dimension_semantics<parallel>], iteration_bounds = array<i64: 1, 1>, scalar_prefetch = 0 : i64, scratch_operands = 0 : i64, tpu.core_type = #tpu.core_type<tc>, window_params = [{transform_indices = @transform_0, window_bounds = array<i64: 8, 16>}, {transform_indices = @transform_1, window_bounds = array<i64: 6, 16>}, {transform_indices = @transform_2, window_bounds = array<i64: 8, 6>}]} {
    %c0 = arith.constant 0 : index
    %c0_0 = arith.constant 0 : index
    %0 = vector.load %arg2[%c0, %c0_0] : memref<8x16xf32, #tpu.memory_space<vmem>>, vector<8x16xf32>
    %c0_1 = arith.constant 0 : index
    %c0_2 = arith.constant 0 : index
    %1 = vector.load %arg3[%c0_1, %c0_2] : memref<6x16xf32, #tpu.memory_space<vmem>>, vector<6x16xf32>
    %cst = arith.constant dense<0.000000e+00> : vector<8x6xf32>
    %2 = tpu.matmul %0, %1, %cst {dimension_numbers = #tpu.dot_dimension_numbers<[1], [1], [0], [0], [0, 0, 1, 0], [], []>} : vector<8x16xf32>, vector<6x16xf32>, vector<8x6xf32> -> vector<8x6xf32>
    %3 = arith.mulf %0, %0 : vector<8x16xf32>
    %cst_3 = arith.constant dense<0.000000e+00> : vector<8xf32>
    %4 = vector.multi_reduction <add>, %3, %cst_3 [1] : vector<8x16xf32> to vector<8xf32>
    %5 = vector.shape_cast %4 : vector<8xf32> to vector<8x1xf32>
    %cst_4 = arith.constant 1.000000e+00 : f32
    %6 = vector.broadcast %cst_4 : f32 to vector<1x16xf32>
    %7 = arith.mulf %1, %1 : vector<6x16xf32>
    %cst_5 = arith.constant dense<0.000000e+00> : vector<1x6xf32>
    %8 = tpu.matmul %6, %7, %cst_5 {dimension_numbers = #tpu.dot_dimension_numbers<[1], [1], [0], [0], [0, 0, 1, 0], [], []>} : vector<1x16xf32>, vector<6x16xf32>, vector<1x6xf32> -> vector<1x6xf32>
    %9 = vector.broadcast %5 : vector<8x1xf32> to vector<8x6xf32>
    %10 = vector.broadcast %8 : vector<1x6xf32> to vector<8x6xf32>
    %11 = arith.addf %9, %10 : vector<8x6xf32>
    %cst_6 = arith.constant 2.000000e+00 : f32
    %12 = vector.broadcast %cst_6 : f32 to vector<8x6xf32>
    %13 = arith.mulf %12, %2 : vector<8x6xf32>
    %14 = arith.subf %11, %13 : vector<8x6xf32>
    %cst_7 = arith.constant 0.000000e+00 : f32
    %15 = vector.broadcast %cst_7 : f32 to vector<8x6xf32>
    %16 = arith.maximumf %14, %15 : vector<8x6xf32>
    %17 = math.sqrt %16 : vector<8x6xf32>
    %c0_8 = arith.constant 0 : index
    %c0_9 = arith.constant 0 : index
    %18 = vector.load %arg4[%c0_8, %c0_9] : memref<8x6xf32, #tpu.memory_space<vmem>>, vector<8x6xf32>
    tpu.vector_store %arg4[%c0_8, %c0_9], %17 {strides = array<i32>} : memref<8x6xf32, #tpu.memory_space<vmem>>, vector<8x6xf32>,
    return
  }
  func.func @transform_0(%arg0: i32, %arg1: i32) -> (i32, i32) {
    %c0_i32 = arith.constant 0 : i32
    %c0_i32_0 = arith.constant 0 : i32
    return %arg0, %c0_i32 : i32, i32
  }
  func.func @transform_1(%arg0: i32, %arg1: i32) -> (i32, i32) {
    %c0_i32 = arith.constant 0 : i32
    %c0_i32_0 = arith.constant 0 : i32
    return %arg1, %c0_i32 : i32, i32
  }
  func.func @transform_2(%arg0: i32, %arg1: i32) -> (i32, i32) {
    %c0_i32 = arith.constant 0 : i32
    return %arg0, %arg1 : i32, i32
  }
}

</mosaic_0001>

<bundles_post_ra>
// kernel: _pairwise_l2.1
= control target key start
LH: loop header
LB: loop body
LE: loop exit
PB: predicated region body
PF: predicated region fallthrough
CT: control target
= control target key end

     0   :  { %7 = vsyncpa [#allocation3], 0  ;;  %s351_s0 = inlined_call_operand.hbm [shape: f32[8,16], index: 0, kind: input, shape index: {}]   ;;  %s352_s1 = inlined_call_operand.hbm [shape: f32[6,16], index: 1, kind: input, shape index: {}]   ;;  %s353_s2 = inlined_call_operand.hbm [shape: f32[8,6], index: 2, kind: output, shape index: {}]  }
   0x1   :  { %8 = vsyncpa [#allocation6], 0 }
   0x2   :  { %9 = vsyncpa [#allocation4], 0  ;;  %s321_s9 = smov [#allocation2]   ;;  %s322_s11 = smov [#allocation5]  }
   0x3   :  { %s16_s10 = sshll.u32 %s321_s9, 4  ;;  %s26_s12 = sshll.u32 %s322_s11, 4  ;;  %s17_s10 = int_to_ptr.vmem [resolvable:$true] %s16_s10  ;;  %s27_s12 = int_to_ptr.vmem [resolvable:$true] %s26_s12 }
   0x4   :  { %s263_s13 = scalar_lea.vmem %s17_s10, 128  ;;  %p268_p1 = scmp.lt.s32.totalorder %s17_s10, %s17_s10 }
   0x5   :  { %p264_p0 = scmp.ne.s32.totalorder %s17_s10, %s263_s13  ;;  %p269_p2 = scmp.lt.s32.totalorder %s263_s13, %s263_s13 }
   0x7   :  { %p270_p3 = por %p269_p2, %p268_p1 }
   0x9   :  { %p271_p4 = pnand %p270_p3, %p264_p0 }
   0xb   :  { %274 = shalt.err (!%p271_p4)
}
   0xc   :  { %19 = dma.hbm_to_vmem [thread:$0]  %s351_s0, 128, %s17_s10, [#allocation3]  }
   0xd   :  { %s283_s16 = scalar_lea.vmem %s27_s12, 128  ;;  %p288_p6 = scmp.lt.s32.totalorder %s27_s12, %s27_s12 }
   0xe   :  { %p284_p5 = scmp.ne.s32.totalorder %s27_s12, %s283_s16  ;;  %p289_p7 = scmp.lt.s32.totalorder %s283_s16, %s283_s16 }
  0x10   :  { %p290_p8 = por %p289_p7, %p288_p6 }
  0x12   :  { %p291_p9 = pnand %p290_p8, %p284_p5 }
  0x14   :  { %294 = shalt.err (!%p291_p9)
}
  0x15   :  { %29 = dma.hbm_to_vmem [thread:$0]  %s352_s1, 128, %s27_s12, [#allocation6]  }
  0x16   :  { %315 = dma.done.wait [#allocation3], 128  }
  0x17   :  { %316 = vsyncadd [#allocation3], 4294967168 }
  0x18   :  { %317 = dma.done.wait [#allocation6], 128  }
  0x19   :  { %318 = vsyncadd [#allocation6], 4294967168  ;;  %v323_v0 = vmov 0.0   ;;  %vm324_vm0 = vmmov 0   ;;  %vm38_vm1 = vcmask 130048   ;;  %v36_v2 = vld [vmem:[#allocation2] sm:$0xff]  ;;  %v196_v7 = vlaneseq }
  0x1a   :  { %237 = vmatprep.subr.mxu0 %v323_v0  ;;  %242 = vmatprep.subr.mxu1 %v323_v0  ;;  %v37_v1 = vld [vmem:[#allocation5] sm:$0x3f]  ;;  %v115_v4 = vmul.f32 %v36_v2, %v36_v2  ;;  %v325_v6 = vmov 1.0   ;;  %s326_s0 = smov [#allocation7]   ;;  %vm211_vm3 = vcmask 48128  }
  0x1b   :  { %239 = vmatprep.mubr.msk.f32.mxu0 %vm324_vm0, %v323_v0  ;;  %244 = vmatprep.mubr.msk.f32.mxu1 %vm324_vm0, %v323_v0  ;;  %v119_v3 = vmul.f32 %v37_v1, %v37_v1  ;;  %v197_v8 = vshrl.u32 %v196_v7, 7  ;;  %s219_s1 = sshll.u32 %s326_s0, 4  ;;  %s220_s1 = int_to_ptr.vmem [resolvable:$true] %s219_s1 }
  0x1c   :  { %238 = vmatpush3.xpose.msk.msra.mxu0 %vm38_vm1, %v37_v1  ;;  %v116_v5 = vsel %vm38_vm1, %v115_v4, 0.0  ;;  %s295_s19 = scalar_lea.vmem %s220_s1, 128  ;;  %p300_p11 = scmp.lt.s32.totalorder %s220_s1, %s220_s1 }
  0x1d   :  { %243 = vmatpush3.xpose.msk.msra.mxu1 %vm38_vm1, %v119_v3  ;;  %117 = vadd.xlane.f32.xlu0 %v116_v5  ;;  %v198_v9 = vsub.s32 0, %v197_v8  ;;  %p296_p10 = scmp.ne.s32.totalorder %s220_s1, %s295_s19  ;;  %p301_p12 = scmp.lt.s32.totalorder %s295_s19, %s295_s19 }
  0x1f   :  { %240 = vmatmul.mubr.msk.f32.vlgmr.msra.gmra.mxu0 %vm38_vm1, %v36_v2  ;;  %p302_p13 = por %p301_p12, %p300_p11 }
  0x20   :  { %245 = vmatmul.mubr.msk.f32.vlgmr.msra.gmra.mxu1 %vm38_vm1, %v325_v6 }
  0x21   :  { %p303_p0 = pnand %p302_p13, %p296_p10 }
  0xa6   :  { %v118_v11 = vpop.xlane.xlu0 %117 }
  0xdf   :  { %v111_v10 = vpop.f32.mrf.mxu0 }
  0xe0   :  { %v192_v12 = vpop.f32.mrf.mxu1  ;;  %v201_v14 = vmul.f32 2.0, %v111_v10 }
  0xe1   :  { %v241_v13 = vpop.f32.mrf.mxu0  ;;  %v199_v15 = vrot.slane %v192_v12, %v198_v9 }
  0xe2   :  { %v246_v16 = vpop.f32.mrf.mxu1 }
  0xe3   :  { %v200_v17 = vadd.f32 %v199_v15, %v118_v11 }
  0xe5   :  { %v202_v18 = vsub.f32 %v200_v17, %v201_v14 }
  0xe7   :  { %v203_v19 = vmax.f32 %v202_v18, 0.0 }
  0xe9   :  { %253 = vrsqrt.f32 %v203_v19  ;;  %vm206_vm2 = vcmp.eq.f32.partialorder %v203_v19, inf  ;;  %v209_v22 = vand.u32 2147483648, %v203_v19  ;;  %vm208_vm4 = vcmp.eq.f32.partialorder %v203_v19, 0.0 }
  0xf6   :  { %v254_v20 = vpop.eup %253 }
  0xf7   :  { %v205_v21 = vmul.f32 %v254_v20, %v203_v19 }
  0xf9   :  { %v207_v23 = vsel %vm206_vm2, %v203_v19, %v205_v21 }
  0xfa   :  { %v210_v24 = vsel %vm208_vm4, %v209_v22, %v207_v23 }
  0xfb   :  { %212 = vst.msk [vmem:[#allocation7] sm:$0xff] %vm211_vm3, %v210_v24 }
  0xfc   :  { %306 = shalt.err (!%p303_p0)
}
  0xfd   :  { %222 = dma.vmem_to_hbm [thread:$0]  %s220_s1, 128, %s353_s2, [#allocation4]  }
  0xfe   :  { %319 = dma.done.wait [#allocation4], 128  }
  0xff   :  { %320 = vsyncadd [#allocation4], 4294967168 }
 0x100   :  { %226 = vsyncpa [#allocation3], 1 }
 0x101   :  { %227 = vsyncpa [#allocation6], 1 }
 0x102   :  { %228 = vsyncpa [#allocation4], 1 }

</bundles_post_ra>
